<compile_context>
chip_gen: v7x
topology: tpu7x:2x2x1
jax: 0.10.0
libtpu: 0.0.40
codegen_flags: <defaults>
</compile_context>

<pallas_src>
import jax
import jax.numpy as jnp
from jax.experimental import pallas as pl
from jax.experimental.pallas import tpu as pltpu

# Logical (PyTorch) dims.
D_IN, D_H1, D_H2, D_OUT = 2048, 200, 20, 1
# Lane-aligned padded dims (zero padding; no change in math).
H1_P, H2_P = 256, 128

TB_MAX = 1024  # max batch-tile rows: 1024*2048*4B = 8 MiB f32 per x tile


def _round_up(n, m):
    return ((n + m - 1) // m) * m


def _choose_tile(B):
    """Sublane-aligned batch tile; guarantees grid >= 2 for B >= 16 (v7x)."""
    if B <= 8:
        return 8
    n_tiles = max(2, pl.cdiv(B, TB_MAX))          # >= 2 so both v7x TCs get work
    return _round_up(pl.cdiv(B, n_tiles), 8)


def disc_f_kernel(x_ref, w1_ref, b1_ref, w2_ref, b2_ref, w3_ref, b3_ref, o_ref):
    # GradientReversal is identity in the forward pass.
    # In-kernel bf16 cast (VPU, hidden under the f32 input DMA).
    x = x_ref[...].astype(jnp.bfloat16)                      # (tb, 2048)

    # Linear(2048 -> 200) + ReLU  (bf16 x bf16 on the MXU, f32 accumulate).
    h1 = jnp.dot(x, w1_ref[...], preferred_element_type=jnp.float32) + b1_ref[...]
    h1 = jnp.maximum(h1, 0.0)                                # (tb, 256); pad cols = 0

    # Linear(200 -> 20) + ReLU  (bf16 x bf16 MXU, f32 accumulate).
    h2 = jnp.dot(h1.astype(jnp.bfloat16), w2_ref[...],
                 preferred_element_type=jnp.float32) + b2_ref[...]
    h2 = jnp.maximum(h2, 0.0)                                # (tb, 128); pad cols = 0

    # Linear(20 -> 1): tiny, done exactly in f32 (VPU multiply + lane reduce).
    out = jnp.sum(h2 * w3_ref[...], axis=-1, keepdims=True) + b3_ref[...]
    o_ref[...] = out.astype(o_ref.dtype)                     # (tb, 1) narrow store


def prepare_params(params):
    """Pad params to lane-aligned shapes; pre-cast matmul weights to bf16."""
    w1, b1, w2, b2, w3, b3 = params
    w1p = jnp.zeros((D_IN, H1_P), jnp.bfloat16).at[:, :D_H1].set(
        w1.astype(jnp.bfloat16))
    b1p = jnp.zeros((1, H1_P), jnp.float32).at[:, :D_H1].set(b1.reshape(1, D_H1))
    w2p = jnp.zeros((H1_P, H2_P), jnp.bfloat16).at[:D_H1, :D_H2].set(
        w2.astype(jnp.bfloat16))
    b2p = jnp.zeros((1, H2_P), jnp.float32).at[:, :D_H2].set(b2.reshape(1, D_H2))
    # w3 is stored as a (1, 128) f32 row vector (transposed, zero padded).
    w3p = jnp.zeros((1, H2_P), jnp.float32).at[:, :D_H2].set(
        w3.reshape(D_H2, D_OUT).T)
    b3p = b3.reshape(1, 1).astype(jnp.float32)
    return (w1p, b1p, w2p, b2p, w3p, b3p)


@jax.jit
def disc_f_forward(x, padded_params):
    w1, b1, w2, b2, w3, b3 = padded_params
    B = x.shape[0]

    tb = _choose_tile(B)
    grid = (pl.cdiv(B, tb),)          # ragged last block handled by Pallas

    # Weights/biases keep a constant block index -> DMA'd once, VMEM-resident.
    resident = lambda shape: pl.BlockSpec(shape, lambda i: (0, 0))

    flops = 2 * B * (D_IN * D_H1 + D_H1 * D_H2 + D_H2 * D_OUT)
    bytes_accessed = (
        x.size * 4                                        # f32 input (only pass)
        + (w1.size + w2.size) * 2                         # bf16 weights
        + (b1.size + b2.size + w3.size + b3.size) * 4     # f32 small params
        + B * D_OUT * 4                                   # narrow f32 output
    )

    out = pl.pallas_call(
        disc_f_kernel,
        out_shape=jax.ShapeDtypeStruct((B, D_OUT), jnp.float32),
        grid=grid,
        in_specs=[
            pl.BlockSpec((tb, D_IN), lambda i: (i, 0)),   # streamed f32 x tiles
            resident((D_IN, H1_P)),                       # w1 (bf16)
            resident((1, H1_P)),                          # b1
            resident((H1_P, H2_P)),                       # w2 (bf16)
            resident((1, H2_P)),                          # b2
            resident((1, H2_P)),                          # w3 row (f32)
            resident((1, 1)),                             # b3
        ],
        out_specs=pl.BlockSpec((tb, D_OUT), lambda i: (i, 0)),
        compiler_params=pltpu.CompilerParams(
            dimension_semantics=("parallel",),
            vmem_limit_bytes=32 << 20,
        ),
        cost_estimate=pl.CostEstimate(
            flops=flops, transcendentals=0, bytes_accessed=bytes_accessed),
    )(x, w1, b1, w2, b2, w3, b3)

    return out


def init_params(key):
    """Deterministic init mimicking nn.Linear default (uniform +/- 1/sqrt(fan_in))."""
    ks = jax.random.split(key, 6)

    def linear(kw, kb, fan_in, fan_out):
        bound = 1.0 / jnp.sqrt(fan_in)
        w = jax.random.uniform(kw, (fan_in, fan_out), jnp.float32, -bound, bound)
        b = jax.random.uniform(kb, (1, fan_out), jnp.float32, -bound, bound)
        return w, b

    w1, b1 = linear(ks[0], ks[1], D_IN, D_H1)
    w2, b2 = linear(ks[2], ks[3], D_H1, D_H2)
    w3, b3 = linear(ks[4], ks[5], D_H2, D_OUT)
    return (w1, b1, w2, b2, w3, b3)


def reference_forward(x, params):
    """Pure-JAX reference mirroring the kernel's bf16 x/w1 and bf16 h1/w2 numerics."""
    w1, b1, w2, b2, w3, b3 = params
    h1 = jnp.dot(x.astype(jnp.bfloat16), w1.astype(jnp.bfloat16),
                 preferred_element_type=jnp.float32) + b1
    h1 = jnp.maximum(h1, 0.0)
    h2 = jnp.dot(h1.astype(jnp.bfloat16), w2.astype(jnp.bfloat16),
                 preferred_element_type=jnp.float32) + b2
    h2 = jnp.maximum(h2, 0.0)
    return h2 @ w3 + b3        # layer 3 exact f32, matching the kernel


if __name__ == "__main__":
    key = jax.random.PRNGKey(0)
    k_x, k_p = jax.random.split(key)

    B = 16  # small batch; exercises grid=2 (two batch tiles of 8 rows)
    x = jax.random.normal(k_x, (B, D_IN), dtype=jnp.float32)
    params = init_params(k_p)
    padded = prepare_params(params)

    out = disc_f_forward(x, padded)
    out = jax.block_until_ready(out)

    ref = reference_forward(x, params)
    assert out.shape == (B, D_OUT), out.shape
    max_err = jnp.max(jnp.abs(out - ref))
    assert jnp.allclose(out, ref, atol=1e-3, rtol=1e-3), f"max abs err {max_err}"

    print("KERNEL_OK")
</pallas_src>

<mosaic_0001>
module attributes {stable_mosaic.version = 11 : i64} {
  func.func @disc_f_kernel(%arg0: i32, %arg1: memref<8x2048xf32, #tpu.memory_space<vmem>>, %arg2: memref<2048x256xbf16, #tpu.memory_space<vmem>>, %arg3: memref<1x256xf32, #tpu.memory_space<vmem>>, %arg4: memref<256x128xbf16, #tpu.memory_space<vmem>>, %arg5: memref<1x128xf32, #tpu.memory_space<vmem>>, %arg6: memref<1x128xf32, #tpu.memory_space<vmem>>, %arg7: memref<1x1xf32, #tpu.memory_space<vmem>>, %arg8: memref<8x1xf32, #tpu.memory_space<vmem>>) attributes {dimension_semantics = [#tpu.dimension_semantics<parallel>], iteration_bounds = array<i64: 2>, scalar_prefetch = 0 : i64, scratch_operands = 0 : i64, tpu.core_type = #tpu.core_type<tc>, window_params = [{transform_indices = @transform_0, window_bounds = array<i64: 8, 2048>}, {pipeline_mode = #tpu.pipeline_mode<synchronous>, transform_indices = @transform_1, window_bounds = array<i64: 2048, 256>}, {pipeline_mode = #tpu.pipeline_mode<synchronous>, transform_indices = @transform_2, window_bounds = array<i64: 1, 256>}, {pipeline_mode = #tpu.pipeline_mode<synchronous>, transform_indices = @transform_3, window_bounds = array<i64: 256, 128>}, {pipeline_mode = #tpu.pipeline_mode<synchronous>, transform_indices = @transform_4, window_bounds = array<i64: 1, 128>}, {pipeline_mode = #tpu.pipeline_mode<synchronous>, transform_indices = @transform_5, window_bounds = array<i64: 1, 128>}, {pipeline_mode = #tpu.pipeline_mode<synchronous>, transform_indices = @transform_6, window_bounds = array<i64: 1, 1>}, {transform_indices = @transform_7, window_bounds = array<i64: 8, 1>}]} {
    %c0 = arith.constant 0 : index
    %c0_0 = arith.constant 0 : index
    %0 = vector.load %arg1[%c0, %c0_0] : memref<8x2048xf32, #tpu.memory_space<vmem>>, vector<8x2048xf32>
    %1 = arith.truncf %0 : vector<8x2048xf32> to vector<8x2048xbf16>
    %c0_1 = arith.constant 0 : index
    %c0_2 = arith.constant 0 : index
    %2 = vector.load %arg2[%c0_1, %c0_2] : memref<2048x256xbf16, #tpu.memory_space<vmem>>, vector<2048x256xbf16>
    %cst = arith.constant dense<0.000000e+00> : vector<8x256xf32>
    %3 = tpu.matmul %1, %2, %cst {dimension_numbers = #tpu.dot_dimension_numbers<[1], [0], [0], [1], [0, 0, 1, 1], [], []>} : vector<8x2048xbf16>, vector<2048x256xbf16>, vector<8x256xf32> -> vector<8x256xf32>
    %c0_3 = arith.constant 0 : index
    %c0_4 = arith.constant 0 : index
    %4 = vector.load %arg3[%c0_3, %c0_4] : memref<1x256xf32, #tpu.memory_space<vmem>>, vector<1x256xf32>
    %5 = vector.broadcast %4 : vector<1x256xf32> to vector<8x256xf32>
    %6 = arith.addf %3, %5 : vector<8x256xf32>
    %cst_5 = arith.constant 0.000000e+00 : f32
    %7 = vector.broadcast %cst_5 : f32 to vector<8x256xf32>
    %8 = arith.maximumf %6, %7 : vector<8x256xf32>
    %9 = arith.truncf %8 : vector<8x256xf32> to vector<8x256xbf16>
    %c0_6 = arith.constant 0 : index
    %c0_7 = arith.constant 0 : index
    %10 = vector.load %arg4[%c0_6, %c0_7] : memref<256x128xbf16, #tpu.memory_space<vmem>>, vector<256x128xbf16>
    %cst_8 = arith.constant dense<0.000000e+00> : vector<8x128xf32>
    %11 = tpu.matmul %9, %10, %cst_8 {dimension_numbers = #tpu.dot_dimension_numbers<[1], [0], [0], [1], [0, 0, 1, 1], [], []>} : vector<8x256xbf16>, vector<256x128xbf16>, vector<8x128xf32> -> vector<8x128xf32>
    %c0_9 = arith.constant 0 : index
    %c0_10 = arith.constant 0 : index
    %12 = vector.load %arg5[%c0_9, %c0_10] : memref<1x128xf32, #tpu.memory_space<vmem>>, vector<1x128xf32>
    %13 = vector.broadcast %12 : vector<1x128xf32> to vector<8x128xf32>
    %14 = arith.addf %11, %13 : vector<8x128xf32>
    %cst_11 = arith.constant 0.000000e+00 : f32
    %15 = vector.broadcast %cst_11 : f32 to vector<8x128xf32>
    %16 = arith.maximumf %14, %15 : vector<8x128xf32>
    %c0_12 = arith.constant 0 : index
    %c0_13 = arith.constant 0 : index
    %17 = vector.load %arg6[%c0_12, %c0_13] : memref<1x128xf32, #tpu.memory_space<vmem>>, vector<1x128xf32>
    %18 = vector.broadcast %17 : vector<1x128xf32> to vector<8x128xf32>
    %19 = arith.mulf %16, %18 : vector<8x128xf32>
    %cst_14 = arith.constant dense<0.000000e+00> : vector<8xf32>
    %20 = vector.multi_reduction <add>, %19, %cst_14 [1] : vector<8x128xf32> to vector<8xf32>
    %21 = vector.shape_cast %20 : vector<8xf32> to vector<8x1xf32>
    %c0_15 = arith.constant 0 : index
    %c0_16 = arith.constant 0 : index
    %22 = vector.load %arg7[%c0_15, %c0_16] : memref<1x1xf32, #tpu.memory_space<vmem>>, vector<1x1xf32>
    %23 = vector.broadcast %22 : vector<1x1xf32> to vector<8x1xf32>
    %24 = arith.addf %21, %23 : vector<8x1xf32>
    %c0_17 = arith.constant 0 : index
    %c0_18 = arith.constant 0 : index
    %25 = vector.load %arg8[%c0_17, %c0_18] : memref<8x1xf32, #tpu.memory_space<vmem>>, vector<8x1xf32>
    tpu.vector_store %arg8[%c0_17, %c0_18], %24 {strides = array<i32>} : memref<8x1xf32, #tpu.memory_space<vmem>>, vector<8x1xf32>,
    return
  }
  func.func @transform_0(%arg0: i32) -> (i32, i32) {
    %c0_i32 = arith.constant 0 : i32
    %c0_i32_0 = arith.constant 0 : i32
    return %arg0, %c0_i32 : i32, i32
  }
  func.func @transform_1(%arg0: i32) -> (i32, i32) {
    %c0_i32 = arith.constant 0 : i32
    %c0_i32_0 = arith.constant 0 : i32
    %c0_i32_1 = arith.constant 0 : i32
    return %c0_i32, %c0_i32_0 : i32, i32
  }
  func.func @transform_2(%arg0: i32) -> (i32, i32) {
    %c0_i32 = arith.constant 0 : i32
    %c0_i32_0 = arith.constant 0 : i32
    %c0_i32_1 = arith.constant 0 : i32
    return %c0_i32, %c0_i32_0 : i32, i32
  }
  func.func @transform_3(%arg0: i32) -> (i32, i32) {
    %c0_i32 = arith.constant 0 : i32
    %c0_i32_0 = arith.constant 0 : i32
    %c0_i32_1 = arith.constant 0 : i32
    return %c0_i32, %c0_i32_0 : i32, i32
  }
  func.func @transform_4(%arg0: i32) -> (i32, i32) {
    %c0_i32 = arith.constant 0 : i32
    %c0_i32_0 = arith.constant 0 : i32
    %c0_i32_1 = arith.constant 0 : i32
    return %c0_i32, %c0_i32_0 : i32, i32
  }
  func.func @transform_5(%arg0: i32) -> (i32, i32) {
    %c0_i32 = arith.constant 0 : i32
    %c0_i32_0 = arith.constant 0 : i32
    %c0_i32_1 = arith.constant 0 : i32
    return %c0_i32, %c0_i32_0 : i32, i32
  }
  func.func @transform_6(%arg0: i32) -> (i32, i32) {
    %c0_i32 = arith.constant 0 : i32
    %c0_i32_0 = arith.constant 0 : i32
    %c0_i32_1 = arith.constant 0 : i32
    return %c0_i32, %c0_i32_0 : i32, i32
  }
  func.func @transform_7(%arg0: i32) -> (i32, i32) {
    %c0_i32 = arith.constant 0 : i32
    %c0_i32_0 = arith.constant 0 : i32
    return %arg0, %c0_i32 : i32, i32
  }
}

</mosaic_0001>

<bundles_post_ra>
// kernel: disc_f_forward.1
= control target key start
LH: loop header
LB: loop body
LE: loop exit
PB: predicated region body
PF: predicated region fallthrough
CT: control target
= control target key end

     0   :  { %s3699_s0 = inlined_call_operand.hbm [shape: f32[16,2048], index: 0, kind: input, shape index: {}]   ;;  %s3700_s1 = inlined_call_operand.hbm [shape: bf16[2048,256], index: 1, kind: input, shape index: {}]   ;;  %s3701_s2 = inlined_call_operand.vmem [shape: f32[1,256], index: 2, kind: input, shape index: {}]   ;;  %s3702_s3 = inlined_call_operand.hbm [shape: bf16[256,128], index: 3, kind: input, shape index: {}]   ;;  %s3703_s4 = inlined_call_operand.vmem [shape: f32[1,128], index: 4, kind: input, shape index: {}]   ;;  %s3704_s5 = inlined_call_operand.vmem [shape: f32[1,128], index: 5, kind: input, shape index: {}]   ;;  %s3705_s6 = inlined_call_operand.<no memory space> [shape: f32[1,1], index: 6, kind: input, shape index: {}]   ;;  %s3706_s7 = inlined_call_operand.vmem [shape: f32[16,1], index: 7, kind: output, shape index: {}]  }
   0x1   :  { %v12_v0 = vstv %s3705_s6 }
   0x2   :  { %13 = vst [vmem:[#allocation2] sm:$0x1] %v12_v0 }
   0x3   :  { %14 = vsyncpa [#allocation4], 0 }
   0x4   :  { %16 = vsyncpa [#allocation4 + $0x1], 0 }
   0x5   :  { %17 = vsyncpa [#allocation6], 0  ;;  %s3500_s26 = smov 0   ;;  %s3502_s27 = smov 0  }
   0x6   :  { %s3504_s28 = smov 0   ;;  %s3506_s29 = smov 0  }
   0x7 LB: > { %s3519_s6 = sadd.s32 4294967295, %s3448_s29   ;;  %p43_p0 = scmp.ne.s32.totalorder %s3440_s27, %s3436_s26  ;;  %s3448_s29 = sphi %s3506_s29, %s3721_s29   ;;  %s3444_s28 = sphi %s3504_s28, %s3720_s28   ;;  %s3440_s27 = sphi %s3502_s27, %s3719_s27   ;;  %s3436_s26 = sphi %s3500_s26, %s3718_s26  }
   0x8   : > { %p3707_p1 = scmp.eq.s32.totalorder %s3519_s6, 0  ;;  %p2520_p2 = scmp.ge.s32.totalorder %s3448_s29, 1 }
   0x9   : > { %p206_p3 = scmp.lt.s32.totalorder %s3448_s29, 3  ;;  %s3450_s9 = smov [#allocation5]  }
   0xa   : > { %p3527_p4 = por %p3707_p1, %p43_p0  ;;  %s218_s10 = sshll.u32 %s3450_s9, 4  ;;  %s219_s10 = int_to_ptr.vmem [resolvable:$true] %s218_s10 }
   0xb   : > { %p3531_p5 = pnand %p2520_p2, %p206_p3  ;;  %s3451_s12 = smov [#allocation7]  }
   0xc   : > { %s3710_s30 = scalar_select %p3527_p4, 1, 0 }
   0xd   : > { %s3711_s8 = scalar_select %p3531_p5, 1, 0 }
   0xe   : > { %p2870_p6 = pneg %p3531_p5  ;;  %s234_s13 = sshll.u32 %s3451_s12, 4  ;;  %s3543_s13 = int_to_ptr.vmem [resolvable:$true] %s234_s13 }
   0xf   : > { %s3324_s16 = scalar_lea.hbm %s3700_s1, 32768 }
  0x10   : > { %p3539_p7 = pnand %p2870_p6, %p3707_p1  ;;  %p3325_p8 = scmp.ne.s32.totalorder %s3700_s1, %s3324_s16 }
  0x11   : > { %p3331_p12 = scmp.lt.u32.totalorder %s3324_s16, %s3700_s1 }
  0x12   : > { %p3326_p9 = pneg %p3539_p7 }
  0x14   : > { %p3327_p10 = pnand %p3326_p9, %p3325_p8 }
  0x16   : > { %p3328_p11 = pneg %p3327_p10 }
  0x18   : > { %p3333_p13 = pnand %p3331_p12, %p3328_p11 }
  0x1a   : > { %3336 = shalt.err (!%p3333_p13)
}
  0x1b   : > { %s3337_s21 = scalar_lea.vmem %s219_s10, 32768  ;;  %p3345_p6 = scmp.lt.s32.totalorder %s219_s10, %s219_s10 }
  0x1c   : > { %p3338_p0 = scmp.ne.s32.totalorder %s219_s10, %s3337_s21  ;;  %p3346_p1 = scmp.lt.s32.totalorder %s3337_s21, %s3337_s21 }
  0x1e   : > { %p3340_p2 = pnand %p3338_p0, %p3326_p9  ;;  %p3347_p4 = por %p3346_p1, %p3345_p6 }
  0x20   : > { %p3341_p3 = pneg %p3340_p2 }
  0x22   : > { %p3348_p5 = pnand %p3347_p4, %p3341_p3 }
  0x24   : > { %3351 = shalt.err (!%p3348_p5)
}
  0x25   : > { %s3452_s22 = smov 128   ;;  %s3453_s23 = smov 8  }
  0x26   : > { %2873 = dma.hbm_to_vmem [thread:$0]  (!%p3539_p7), %s3700_s1, 32768, %s219_s10, [#allocation6], %s3452_s22, %s3452_s22, %s3453_s23  }
  0x27   : > { %s3352_s12 = scalar_lea.hbm %s3702_s3, 2048 }
  0x28   : > { %p3353_p8 = scmp.ne.s32.totalorder %s3702_s3, %s3352_s12  ;;  %p3359_p5 = scmp.lt.u32.totalorder %s3352_s12, %s3702_s3 }
  0x2a   : > { %p3355_p1 = pnand %p3353_p8, %p3326_p9 }
  0x2c   : > { %p3356_p4 = pneg %p3355_p1 }
  0x2e   : > { %p3361_p10 = pnand %p3359_p5, %p3356_p4 }
  0x30   : > { %3364 = shalt.err (!%p3361_p10)
}
  0x31   : > { %s3365_s10 = scalar_lea.vmem %s3543_s13, 2048  ;;  %p3373_p0 = scmp.lt.s32.totalorder %s3543_s13, %s3543_s13 }
  0x32   : > { %p3366_p11 = scmp.ne.s32.totalorder %s3543_s13, %s3365_s10  ;;  %p3374_p2 = scmp.lt.s32.totalorder %s3365_s10, %s3365_s10 }
  0x34   : > { %p3368_p12 = pnand %p3366_p11, %p3326_p9  ;;  %p3375_p3 = por %p3374_p2, %p3373_p0 }
  0x36   : > { %p3369_p13 = pneg %p3368_p12 }
  0x38   : > { %p3376_p6 = pnand %p3375_p3, %p3369_p13 }
  0x3a   : > { %3379 = shalt.err (!%p3376_p6)
}
  0x3b   : > { %s3454_s18 = smov 64   ;;  %s3455_s19 = smov 4  }
  0x3c   : > { %2876 = dma.hbm_to_vmem [thread:$0]  (!%p3539_p7), %s3702_s3, 2048, %s3543_s13, [#allocation6], %s3454_s18, %s3454_s18, %s3455_s19  }
  0x3d   : > { %s3593_s22 = sadd.s32 1, %s3448_s29   ;;  %s30_s24 = sadd.s32 1, %s3444_s28 }
  0x3e   : > { %s27_s23 = ssub.s32 %s3448_s29, %s3593_s22  ;;  %p37_p8 = scmp.ne.s32.totalorder %s3444_s28, %s3440_s27 }
  0x3f   : > { %p28_p9 = scmp.eq.s32.totalorder %s27_s23, 0  ;;  %p38_p1 = scmp.eq.s32.totalorder %s3448_s29, 0 }
  0x40   : > { %p2883_p5 = scmp.lt.s32.totalorder %s3448_s29, 2  ;;  %s257_s26 = sand.u32 1, %s3444_s28  }
  0x41   : > { %s3602_s25 = scalar_select %p28_p9, %s3444_s28, %s30_s24  }
  0x42   : > { %p39_p4 = por %p38_p1, %p37_p8  ;;  %s2809_s9 = sshll.u32 %s3448_s29, 11 }
  0x43   : > { %s2524_s12 = sshll.u32 %s257_s26, 7  ;;  %s3610_s15 = scalar_lea.hbm %s3699_s0, %s2809_s9 }
  0x44   : > { %s261_s13 = scalar_lea.vmem [#allocation3], %s2524_s12  ;;  %p3612_p7 = pnand %p2883_p5, %p39_p4 }
  0x45   : > { %s269_s16 = sshll.u32 %s261_s13, 4  ;;  %s258_s29 = scalar_lea.sflag [#allocation4], %s257_s26  ;;  %s3616_s16 = int_to_ptr.vmem [resolvable:$true] %s269_s16 }
  0x46   : > { %s3380_s10 = scalar_lea.hbm %s3610_s15, 2048  ;;  %p3382_p11 = pneg %p3612_p7 }
  0x47   : > { %p3381_p10 = scmp.ne.s32.totalorder %s3610_s15, %s3380_s10  ;;  %s3385_s20 = scalar_lea.hbm %s3699_s0, 4096 }
  0x48   : > { %p3386_p0 = scmp.lt.u32.totalorder %s3610_s15, %s3699_s0  ;;  %p3387_p2 = scmp.lt.u32.totalorder %s3385_s20, %s3380_s10 }
  0x49   : > { %p3383_p12 = pnand %p3382_p11, %p3381_p10  ;;  %p3389_p6 = scmp.lt.u32.totalorder %s3380_s10, %s3610_s15 }
  0x4a   : > { %p3388_p3 = por %p3387_p2, %p3386_p0 }
  0x4b   : > { %p3384_p13 = pneg %p3383_p12 }
  0x4c   : > { %p3390_p9 = por %p3389_p6, %p3388_p3 }
  0x4e   : > { %p3391_p8 = pnand %p3390_p9, %p3384_p13 }
  0x50   : > { %3394 = shalt.err (!%p3391_p8)
}
  0x51   : > { %s3395_s24 = scalar_lea.vmem %s3616_s16, 2048  ;;  %s3456_s26 = smov [#allocation3]  }
  0x52   : > { %p3396_p1 = scmp.ne.s32.totalorder %s3616_s16, %s3395_s24  ;;  %s3400_s9 = sshll.u32 %s3456_s26, 4  ;;  %s3401_s9 = int_to_ptr.vmem [resolvable:$false] %s3400_s9 }
  0x53   : > { %s3402_s12 = scalar_lea.vmem %s3401_s9, 4096  ;;  %p3403_p10 = scmp.lt.s32.totalorder %s3616_s16, %s3401_s9 }
  0x54   : > { %p3398_p4 = pnand %p3396_p1, %p3382_p11  ;;  %p3404_p12 = scmp.lt.s32.totalorder %s3402_s12, %s3395_s24 }
  0x56   : > { %p3399_p5 = pneg %p3398_p4  ;;  %p3405_p0 = por %p3404_p12, %p3403_p10 }
  0x58   : > { %p3406_p2 = pnand %p3405_p0, %p3399_p5 }
  0x5a   : > { %3409 = shalt.err (!%p3406_p2)
}
  0x5b   : > { %2880 = dma.hbm_to_vmem [thread:$0]  (!%p3612_p7), %s3610_s15, 2048, %s3616_s16, %s258_s29  }
  0x5c   : > { %p3714_p13 = scmp.ne.s32.totalorder %s3711_s8, 0 }
  0x5d   : > { %s280_s11 = sand.u32 (!%p3714_p13), 1, %s3440_s27   ;;  %p3715_p11 = scmp.ne.s32.totalorder (!%p3714_p13), %s3710_s30, 0 }
  0x5e   : > { %278 = sbr.rel (%p3714_p13) target bundleno = 950 (0x3b6), region = 48  ;;  %s2528_s14 = sshll.u32 (!%p3714_p13), %s280_s11, 7 }
  0x5f   : > { %s281_s13 = scalar_lea.sflag (!%p3714_p13), [#allocation4], %s280_s11  ;;  %s3646_s10 = scalar_lea.vmem (!%p3714_p13), [#allocation3], %s2528_s14 }
  0x65   : > { %3427 = dma.done.wait (%p3715_p11), %s281_s13, 2048  }
  0x66   : > { %3429 = vsyncadd (%p3715_p11), %s281_s13, 4294965248  ;;  %p3716_p3 = scmp.eq.s32.totalorder %s3519_s6, 0 }
  0x68   : > { %3431 = dma.done.wait (%p3716_p3), [#allocation6], 34816   ;;  %p3717_p7 = pmov %p3716_p3 }
  0x69   : > { %v2924_v1 = vld [vmem:[#allocation5 + $0x4] ss:$8 sps:$4 sm:$0xff]   ;;  %v2928_v3 = vld [vmem:[#allocation5] ss:$8 sps:$4 sm:$0xff]   ;;  %v2930_v5 = vld [vmem:[#allocation5 + $0x14] ss:$8 sps:$4 sm:$0xff]  }
  0x6a   : > { %3433 = vsyncadd (%p3717_p7), [#allocation6], 4294932480  ;;  %v2926_v2 = vld [vmem:[#allocation5 + $0x404] ss:$8 sps:$4 sm:$0xff]   ;;  %1907 = vmatprep.subr.bf16.mxu1 %v2924_v1  ;;  %v2929_v4 = vld [vmem:[#allocation5 + $0x400] ss:$8 sps:$4 sm:$0xff]  }
  0x6b   : > { %2071 = vmatprep.subr.bf16.mxu0 %v2926_v2  ;;  %1908 = vmatpush1.bf16.msra.mxu1 %v2928_v3  ;;  %v2932_v6 = vld [vmem:[#allocation5 + $0x414] ss:$8 sps:$4 sm:$0xff]   ;;  %v2934_v7 = vld [vmem:[#allocation5 + $0x10] ss:$8 sps:$4 sm:$0xff]   ;;  %v2936_v9 = vld [vmem:[#allocation5 + $0x24] ss:$8 sps:$4 sm:$0xff]  }
  0x6c   : > { %2072 = vmatpush1.bf16.msra.mxu0 %v2929_v4  ;;  %1909 = vmatprep.subr.bf16.mxu1 %v2930_v5  ;;  %v2935_v8 = vld [vmem:[#allocation5 + $0x410] ss:$8 sps:$4 sm:$0xff]   ;;  %v2938_v10 = vld [vmem:[#allocation5 + $0x424] ss:$8 sps:$4 sm:$0xff]   ;;  %v2940_v11 = vld [vmem:[#allocation5 + $0x20] ss:$8 sps:$4 sm:$0xff]  }
  0x6d   : > { %2073 = vmatprep.subr.bf16.mxu0 %v2932_v6  ;;  %v2941_v12 = vld [vmem:[#allocation5 + $0x420] ss:$8 sps:$4 sm:$0xff]   ;;  %v2942_v13 = vld [vmem:[#allocation5 + $0x34] ss:$8 sps:$4 sm:$0xff]   ;;  %v2946_v15 = vld [vmem:[#allocation5 + $0x30] ss:$8 sps:$4 sm:$0xff]  }
  0x6e   : > { %v2944_v14 = vld [vmem:[#allocation5 + $0x434] ss:$8 sps:$4 sm:$0xff]   ;;  %v2947_v16 = vld [vmem:[#allocation5 + $0x430] ss:$8 sps:$4 sm:$0xff]   ;;  %v2948_v17 = vld [vmem:[#allocation5 + $0x44] ss:$8 sps:$4 sm:$0xff]  }
  0x6f   : > { %1910 = vmatpush1.bf16.msra.mxu1 %v2934_v7  ;;  %v2950_v18 = vld [vmem:[#allocation5 + $0x444] ss:$8 sps:$4 sm:$0xff]   ;;  %v2952_v19 = vld [vmem:[#allocation5 + $0x40] ss:$8 sps:$4 sm:$0xff]   ;;  %v2954_v21 = vld [vmem:[#allocation5 + $0x54] ss:$8 sps:$4 sm:$0xff]  }
  0x70   : > { %2074 = vmatpush1.bf16.msra.mxu0 %v2935_v8  ;;  %1911 = vmatprep.subr.bf16.mxu1 %v2936_v9  ;;  %v2953_v20 = vld [vmem:[#allocation5 + $0x440] ss:$8 sps:$4 sm:$0xff]   ;;  %v2956_v22 = vld [vmem:[#allocation5 + $0x454] ss:$8 sps:$4 sm:$0xff]   ;;  %v2958_v23 = vld [vmem:[#allocation5 + $0x50] ss:$8 sps:$4 sm:$0xff]  }
  0x71   : > { %2075 = vmatprep.subr.bf16.mxu0 %v2938_v10  ;;  %v2959_v24 = vld [vmem:[#allocation5 + $0x450] ss:$8 sps:$4 sm:$0xff]   ;;  %v2960_v25 = vld [vmem:[#allocation5 + $0x64] ss:$8 sps:$4 sm:$0xff]   ;;  %v2964_v27 = vld [vmem:[#allocation5 + $0x60] ss:$8 sps:$4 sm:$0xff]  }
  0x72   : > { %v2962_v26 = vld [vmem:[#allocation5 + $0x464] ss:$8 sps:$4 sm:$0xff]   ;;  %v2965_v28 = vld [vmem:[#allocation5 + $0x460] ss:$8 sps:$4 sm:$0xff]   ;;  %v2966_v29 = vld [vmem:[#allocation5 + $0x74] ss:$8 sps:$4 sm:$0xff]  }
  0x73   : > { %1912 = vmatpush1.bf16.msra.mxu1 %v2940_v11  ;;  %v2968_v30 = vld [vmem:[#allocation5 + $0x474] ss:$8 sps:$4 sm:$0xff]   ;;  %v2970_v31 = vld [vmem:[#allocation5 + $0x70] ss:$8 sps:$4 sm:$0xff]   ;;  %v2972_v33 = vld [vmem:[#allocation5 + $0x84] ss:$8 sps:$4 sm:$0xff]  }
  0x74   : > { %2076 = vmatpush1.bf16.msra.mxu0 %v2941_v12  ;;  %1913 = vmatprep.subr.bf16.mxu1 %v2942_v13  ;;  %v2971_v32 = vld [vmem:[#allocation5 + $0x470] ss:$8 sps:$4 sm:$0xff]   ;;  %v2974_v34 = vld [vmem:[#allocation5 + $0x484] ss:$8 sps:$4 sm:$0xff]   ;;  %v2976_v35 = vld [vmem:[#allocation5 + $0x80] ss:$8 sps:$4 sm:$0xff]  }
  0x75   : > { %2077 = vmatprep.subr.bf16.mxu0 %v2944_v14  ;;  %v2977_v36 = vld [vmem:[#allocation5 + $0x480] ss:$8 sps:$4 sm:$0xff]   ;;  %v2978_v37 = vld [vmem:[#allocation5 + $0x94] ss:$8 sps:$4 sm:$0xff]   ;;  %v2982_v39 = vld [vmem:[#allocation5 + $0x90] ss:$8 sps:$4 sm:$0xff]  }
  0x76   : > { %v2980_v38 = vld [vmem:[#allocation5 + $0x494] ss:$8 sps:$4 sm:$0xff]   ;;  %v2983_v40 = vld [vmem:[#allocation5 + $0x490] ss:$8 sps:$4 sm:$0xff]   ;;  %v2984_v41 = vld [vmem:[#allocation5 + $0xa4] ss:$8 sps:$4 sm:$0xff]  }
  0x77   : > { %1914 = vmatpush1.bf16.msra.mxu1 %v2946_v15  ;;  %v2986_v42 = vld [vmem:[#allocation5 + $0x4a4] ss:$8 sps:$4 sm:$0xff]   ;;  %v2988_v43 = vld [vmem:[#allocation5 + $0xa0] ss:$8 sps:$4 sm:$0xff]   ;;  %v2990_v45 = vld [vmem:[#allocation5 + $0xb4] ss:$8 sps:$4 sm:$0xff]  }
  0x78   : > { %2078 = vmatpush1.bf16.msra.mxu0 %v2947_v16  ;;  %1915 = vmatprep.subr.bf16.mxu1 %v2948_v17  ;;  %v2989_v44 = vld [vmem:[#allocation5 + $0x4a0] ss:$8 sps:$4 sm:$0xff]   ;;  %v2992_v46 = vld [vmem:[#allocation5 + $0x4b4] ss:$8 sps:$4 sm:$0xff]   ;;  %v2994_v48 = vld [vmem:[#allocation5 + $0xb0] ss:$8 sps:$4 sm:$0xff]  }
  0x79   : > { %2079 = vmatprep.subr.bf16.mxu0 %v2950_v18  ;;  %v328_v47 = vld [vmem:[%s3646_s10 + $0x8] sm:$0xff]  ;;  %v2995_v50 = vld [vmem:[#allocation5 + $0x4b0] ss:$8 sps:$4 sm:$0xff]   ;;  %v3002_v57 = vld [vmem:[#allocation5 + $0xd4] ss:$8 sps:$4 sm:$0xff]   ;;  %p322_p6 = scmp.lt.s32.totalorder %s3519_s6, 1 }
  0x7a   : > { %v344_v49 = vpack.c.bf16 %v328_v47, %v328_v47  ;;  %v336_v51 = vld [vmem:[%s3646_s10 + $0x48] sm:$0xff]  ;;  %v3004_v58 = vld [vmem:[#allocation5 + $0x4d4] ss:$8 sps:$4 sm:$0xff]   ;;  %v3006_v59 = vld [vmem:[#allocation5 + $0xd0] ss:$8 sps:$4 sm:$0xff]   ;;  %vm2433_vm0 = vcmask 7168  }
  0x7b   : > { %1916 = vmatpush1.bf16.msra.mxu1 %v2952_v19  ;;  %v2996_v52 = vld [vmem:[#allocation5 + $0xc4] ss:$8 sps:$4 sm:$0xff]   ;;  %v352_v54 = vpack.c.bf16 %v336_v51, %v336_v51  ;;  %v3000_v55 = vld [vmem:[#allocation5 + $0xc0] ss:$8 sps:$4 sm:$0xff]   ;;  %v3007_v60 = vld [vmem:[#allocation5 + $0x4d0] ss:$8 sps:$4 sm:$0xff]  }
  0x7c   : > { %2080 = vmatpush1.bf16.msra.mxu0 %v2953_v20  ;;  %1917 = vmatprep.subr.bf16.mxu1 %v2954_v21  ;;  %v2998_v53 = vld [vmem:[#allocation5 + $0x4c4] ss:$8 sps:$4 sm:$0xff]   ;;  %v3001_v56 = vld [vmem:[#allocation5 + $0x4c0] ss:$8 sps:$4 sm:$0xff]   ;;  %v3014_v1 = vld [vmem:[#allocation5 + $0xf4] ss:$8 sps:$4 sm:$0xff]  }
  0x7d   : > { %2081 = vmatprep.subr.bf16.mxu0 %v2956_v22  ;;  %1939 = vmatprep.mubr.bf16.mxu1 %v344_v49  ;;  %v3008_v61 = vld [vmem:[#allocation5 + $0xe4] ss:$8 sps:$4 sm:$0xff]   ;;  %v3012_v63 = vld [vmem:[#allocation5 + $0xe0] ss:$8 sps:$4 sm:$0xff]   ;;  %v3016_v2 = vld [vmem:[#allocation5 + $0x4f4] ss:$8 sps:$4 sm:$0xff]  }
  0x7e   : > { %2103 = vmatprep.mubr.bf16.mxu0 %v352_v54  ;;  %v3010_v62 = vld [vmem:[#allocation5 + $0x4e4] ss:$8 sps:$4 sm:$0xff]   ;;  %v3013_v0 = vld [vmem:[#allocation5 + $0x4e0] ss:$8 sps:$4 sm:$0xff]   ;;  %v3018_v3 = vld [vmem:[#allocation5 + $0xf0] ss:$8 sps:$4 sm:$0xff]  }
  0x7f   : > { %1918 = vmatpush1.bf16.msra.mxu1 %v2958_v23  ;;  %v3019_v4 = vld [vmem:[#allocation5 + $0x4f0] ss:$8 sps:$4 sm:$0xff]   ;;  %v3022_v5 = vld [vmem:[#allocation5 + $0x104] ss:$8 sps:$4 sm:$0xff]   ;;  %v3020_v9 = vld [vmem:[#allocation5 + $0x100] ss:$8 sps:$4 sm:$0xff]  }
  0x80   : > { %2082 = vmatpush1.bf16.msra.mxu0 %v2959_v24  ;;  %1919 = vmatprep.subr.bf16.mxu1 %v2960_v25  ;;  %v327_v6 = vld [vmem:[%s3646_s10] sm:$0xff]  ;;  %v3028_v13 = vld [vmem:[#allocation5 + $0x114] ss:$8 sps:$4 sm:$0xff]   ;;  %v3026_v15 = vld [vmem:[#allocation5 + $0x110] ss:$8 sps:$4 sm:$0xff]   ;;  %s3723_s6 = smov (!%p322_p6, %s3519_s6), 1 }
  0x81   : > { %2083 = vmatprep.subr.bf16.mxu0 %v2962_v26  ;;  %v335_v7 = vld [vmem:[%s3646_s10 + $0x40] sm:$0xff]  ;;  %v343_v11 = vpack.c.bf16 %v327_v6, %v327_v6  ;;  %v3031_v14 = vld [vmem:[#allocation5 + $0x514] ss:$8 sps:$4 sm:$0xff]   ;;  %v3029_v16 = vld [vmem:[#allocation5 + $0x510] ss:$8 sps:$4 sm:$0xff]   ;;  %s2531_s18 = sshll.u32 %s3723_s6, 3 }
  0x82   : > { %v3025_v8 = vld [vmem:[#allocation5 + $0x504] ss:$8 sps:$4 sm:$0xff]   ;;  %v3023_v10 = vld [vmem:[#allocation5 + $0x500] ss:$8 sps:$4 sm:$0xff]   ;;  %v351_v12 = vpack.c.bf16 %v335_v7, %v335_v7  ;;  %v3040_v21 = vld [vmem:[#allocation5 + $0x134] ss:$8 sps:$4 sm:$0xff]   ;;  %s325_s21 = scalar_lea.vmem %s3706_s7, %s2531_s18 }
  0x83   : > { %1920 = vmatpush1.bf16.msra.mxu1 %v2964_v27  ;;  %v3034_v17 = vld [vmem:[#allocation5 + $0x124] ss:$8 sps:$4 sm:$0xff]   ;;  %v3032_v19 = vld [vmem:[#allocation5 + $0x120] ss:$8 sps:$4 sm:$0xff]   ;;  %v3043_v22 = vld [vmem:[#allocation5 + $0x534] ss:$8 sps:$4 sm:$0xff]  }
  0x84   : > { %2084 = vmatpush1.bf16.msra.mxu0 %v2965_v28  ;;  %1921 = vmatprep.subr.bf16.mxu1 %v2966_v29  ;;  %v3037_v18 = vld [vmem:[#allocation5 + $0x524] ss:$8 sps:$4 sm:$0xff]   ;;  %v3035_v20 = vld [vmem:[#allocation5 + $0x520] ss:$8 sps:$4 sm:$0xff]   ;;  %v3038_v23 = vld [vmem:[#allocation5 + $0x130] ss:$8 sps:$4 sm:$0xff]  }
  0x85   : > { %2085 = vmatprep.subr.bf16.mxu0 %v2968_v30  ;;  %v3041_v24 = vld [vmem:[#allocation5 + $0x530] ss:$8 sps:$4 sm:$0xff]   ;;  %v3046_v25 = vld [vmem:[#allocation5 + $0x144] ss:$8 sps:$4 sm:$0xff]   ;;  %v3044_v27 = vld [vmem:[#allocation5 + $0x140] ss:$8 sps:$4 sm:$0xff]  }
  0x86   : > { %v3049_v26 = vld [vmem:[#allocation5 + $0x544] ss:$8 sps:$4 sm:$0xff]   ;;  %v3047_v28 = vld [vmem:[#allocation5 + $0x540] ss:$8 sps:$4 sm:$0xff]   ;;  %v3052_v29 = vld [vmem:[#allocation5 + $0x154] ss:$8 sps:$4 sm:$0xff]  }
  0x87   : > { %1922 = vmatpush1.bf16.msra.mxu1 %v2970_v31  ;;  %v3055_v30 = vld [vmem:[#allocation5 + $0x554] ss:$8 sps:$4 sm:$0xff]   ;;  %v3050_v31 = vld [vmem:[#allocation5 + $0x150] ss:$8 sps:$4 sm:$0xff]   ;;  %v3068_v47 = vld [vmem:[#allocation5 + $0x180] ss:$8 sps:$4 sm:$0xff]  }
  0x88   : > { %2086 = vmatpush1.bf16.msra.mxu0 %v2971_v32  ;;  %1923 = vmatprep.subr.bf16.mxu1 %v2972_v33  ;;  %v3053_v32 = vld [vmem:[#allocation5 + $0x550] ss:$8 sps:$4 sm:$0xff]   ;;  %v3058_v33 = vld [vmem:[#allocation5 + $0x164] ss:$8 sps:$4 sm:$0xff]   ;;  %v3076_v49 = vld [vmem:[#allocation5 + $0x194] ss:$8 sps:$4 sm:$0xff]  }
  0x89   : > { %2087 = vmatprep.subr.bf16.mxu0 %v2974_v34  ;;  %v3061_v34 = vld [vmem:[#allocation5 + $0x564] ss:$8 sps:$4 sm:$0xff]   ;;  %v3074_v51 = vld [vmem:[#allocation5 + $0x190] ss:$8 sps:$4 sm:$0xff]   ;;  %v3104_v7 = vld [vmem:[#allocation5 + $0x1e0] ss:$8 sps:$4 sm:$0xff]  }
  0x8a   : > { %v3085_v54 = vld [vmem:[#allocation5 + $0x5a4] ss:$8 sps:$4 sm:$0xff]  }
  0x8b   : > { %1924 = vmatpush1.bf16.msra.mxu1 %v2976_v35  ;;  %v330_v35 = vld [vmem:[%s3646_s10 + $0x18] sm:$0xff]  ;;  %v3109_v6 = vld [vmem:[#allocation5 + $0x5e4] ss:$8 sps:$4 sm:$0xff]  }
  0x8c   : > { %2088 = vmatpush1.bf16.msra.mxu0 %v2977_v36  ;;  %1925 = vmatprep.subr.bf16.mxu1 %v2978_v37  ;;  %v3056_v36 = vld [vmem:[#allocation5 + $0x160] ss:$8 sps:$4 sm:$0xff]   ;;  %v346_v37 = vpack.c.bf16 %v330_v35, %v330_v35  ;;  %v3134_v35 = vld [vmem:[#allocation5 + $0x230] ss:$8 sps:$4 sm:$0xff]  }
  0x8d   : > { %2089 = vmatprep.subr.bf16.mxu0 %v2980_v38  ;;  %v3059_v38 = vld [vmem:[#allocation5 + $0x560] ss:$8 sps:$4 sm:$0xff]  }
  0x8f   : > { %1926 = vmatpush1.bf16.msra.mxu1 %v2982_v39  ;;  %v338_v39 = vld [vmem:[%s3646_s10 + $0x58] sm:$0xff] }
  0x90   : > { %2090 = vmatpush1.bf16.msra.mxu0 %v2983_v40  ;;  %1927 = vmatprep.subr.bf16.mxu1 %v2984_v41  ;;  %v3064_v40 = vld [vmem:[#allocation5 + $0x174] ss:$8 sps:$4 sm:$0xff]  }
  0x91   : > { %2091 = vmatprep.subr.bf16.mxu0 %v2986_v42  ;;  %v3067_v41 = vld [vmem:[#allocation5 + $0x574] ss:$8 sps:$4 sm:$0xff]   ;;  %v354_v42 = vpack.c.bf16 %v338_v39, %v338_v39  ;;  %v3140_v39 = vld [vmem:[#allocation5 + $0x240] ss:$8 sps:$4 sm:$0xff]  }
  0x93   : > { %1928 = vmatpush1.bf16.msra.mxu1 %v2988_v43  ;;  %v3062_v43 = vld [vmem:[#allocation5 + $0x170] ss:$8 sps:$4 sm:$0xff]  }
  0x94   : > { %2092 = vmatpush1.bf16.msra.mxu0 %v2989_v44  ;;  %1929 = vmatprep.subr.bf16.mxu1 %v2990_v45  ;;  %v3065_v44 = vld [vmem:[#allocation5 + $0x570] ss:$8 sps:$4 sm:$0xff]   ;;  %v3070_v45 = vld [vmem:[#allocation5 + $0x184] ss:$8 sps:$4 sm:$0xff]  }
  0x95   : > { %2093 = vmatprep.subr.bf16.mxu0 %v2992_v46  ;;  %v3073_v46 = vld [vmem:[#allocation5 + $0x584] ss:$8 sps:$4 sm:$0xff]  }
  0x97   : > { %1930 = vmatpush1.bf16.msra.mxu1 %v2994_v48  ;;  %v3071_v48 = vld [vmem:[#allocation5 + $0x580] ss:$8 sps:$4 sm:$0xff]  }
  0x98   : > { %2094 = vmatpush1.bf16.msra.mxu0 %v2995_v50  ;;  %1931 = vmatprep.subr.bf16.mxu1 %v2996_v52  ;;  %v3079_v50 = vld [vmem:[#allocation5 + $0x594] ss:$8 sps:$4 sm:$0xff]   ;;  %v3077_v52 = vld [vmem:[#allocation5 + $0x590] ss:$8 sps:$4 sm:$0xff]  }
  0x99   : > { %2095 = vmatprep.subr.bf16.mxu0 %v2998_v53  ;;  %v3082_v53 = vld [vmem:[#allocation5 + $0x1a4] ss:$8 sps:$4 sm:$0xff]  }
  0x9b   : > { %1932 = vmatpush1.bf16.msra.mxu1 %v3000_v55  ;;  %v3080_v55 = vld [vmem:[#allocation5 + $0x1a0] ss:$8 sps:$4 sm:$0xff]  }
  0x9c   : > { %2096 = vmatpush1.bf16.msra.mxu0 %v3001_v56  ;;  %1933 = vmatprep.subr.bf16.mxu1 %v3002_v57  ;;  %v3083_v56 = vld [vmem:[#allocation5 + $0x5a0] ss:$8 sps:$4 sm:$0xff]   ;;  %v3088_v57 = vld [vmem:[#allocation5 + $0x1b4] ss:$8 sps:$4 sm:$0xff]  }
  0x9d   : > { %2097 = vmatprep.subr.bf16.mxu0 %v3004_v58  ;;  %v3091_v58 = vld [vmem:[#allocation5 + $0x5b4] ss:$8 sps:$4 sm:$0xff]  }
  0x9f   : > { %1934 = vmatpush1.bf16.msra.mxu1 %v3006_v59  ;;  %v3086_v59 = vld [vmem:[#allocation5 + $0x1b0] ss:$8 sps:$4 sm:$0xff]  }
  0xa0   : > { %2098 = vmatpush1.bf16.msra.mxu0 %v3007_v60  ;;  %1935 = vmatprep.subr.bf16.mxu1 %v3008_v61  ;;  %v3089_v60 = vld [vmem:[#allocation5 + $0x5b0] ss:$8 sps:$4 sm:$0xff]   ;;  %v3094_v61 = vld [vmem:[#allocation5 + $0x1c4] ss:$8 sps:$4 sm:$0xff]  }
  0xa1   : > { %2099 = vmatprep.subr.bf16.mxu0 %v3010_v62  ;;  %v3097_v62 = vld [vmem:[#allocation5 + $0x5c4] ss:$8 sps:$4 sm:$0xff]  }
  0xa3   : > { %1936 = vmatpush1.bf16.msra.mxu1 %v3012_v63  ;;  %v3092_v63 = vld [vmem:[#allocation5 + $0x1c0] ss:$8 sps:$4 sm:$0xff]  }
  0xa4   : > { %2100 = vmatpush1.bf16.msra.mxu0 %v3013_v0  ;;  %1937 = vmatprep.subr.bf16.mxu1 %v3014_v1  ;;  %v3095_v0 = vld [vmem:[#allocation5 + $0x5c0] ss:$8 sps:$4 sm:$0xff]   ;;  %v3100_v1 = vld [vmem:[#allocation5 + $0x1d4] ss:$8 sps:$4 sm:$0xff]  }
  0xa5   : > { %2101 = vmatprep.subr.bf16.mxu0 %v3016_v2  ;;  %v3103_v2 = vld [vmem:[#allocation5 + $0x5d4] ss:$8 sps:$4 sm:$0xff]  }
  0xa7   : > { %1938 = vmatpush1.bf16.msra.mxu1 %v3018_v3  ;;  %v3098_v3 = vld [vmem:[#allocation5 + $0x1d0] ss:$8 sps:$4 sm:$0xff]  }
  0xa8   : > { %2102 = vmatpush1.bf16.msra.mxu0 %v3019_v4  ;;  %1948 = vmatprep.subr.bf16.mxu1 %v3022_v5  ;;  %v3101_v4 = vld [vmem:[#allocation5 + $0x5d0] ss:$8 sps:$4 sm:$0xff]   ;;  %v3106_v5 = vld [vmem:[#allocation5 + $0x1e4] ss:$8 sps:$4 sm:$0xff]  }
  0xa9   : > { %2112 = vmatprep.subr.bf16.mxu0 %v3025_v8  ;;  %v3107_v8 = vld [vmem:[#allocation5 + $0x5e0] ss:$8 sps:$4 sm:$0xff]  }
  0xaa   : > { %1940 = vmatmul.mubr.bf16.vlgmr.msra.gmra.mrb[0].mxu1 %v343_v11  ;;  %v3110_v11 = vld [vmem:[#allocation5 + $0x1f0] ss:$8 sps:$4 sm:$0xff]  }
  0xab   : > { %2104 = vmatmul.mubr.bf16.vlgmr.msra.gmra.mrb[0].mxu0 %v351_v12  ;;  %1949 = vmatpush1.bf16.msra.mxu1 %v3020_v9  ;;  %v3112_v9 = vld [vmem:[#allocation5 + $0x1f4] ss:$8 sps:$4 sm:$0xff]   ;;  %v3113_v12 = vld [vmem:[#allocation5 + $0x5f0] ss:$8 sps:$4 sm:$0xff]  }
  0xac   : > { %2113 = vmatpush1.bf16.msra.mxu0 %v3023_v10  ;;  %1950 = vmatprep.subr.bf16.mxu1 %v3028_v13  ;;  %v3115_v10 = vld [vmem:[#allocation5 + $0x5f4] ss:$8 sps:$4 sm:$0xff]   ;;  %v3118_v13 = vld [vmem:[#allocation5 + $0x204] ss:$8 sps:$4 sm:$0xff]  }
  0xad   : > { %2114 = vmatprep.subr.bf16.mxu0 %v3031_v14  ;;  %1980 = vmatprep.mubr.bf16.mxu1 %v346_v37  ;;  %v329_v14 = vld [vmem:[%s3646_s10 + $0x10] sm:$0xff]  ;;  %v3142_v37 = vld [vmem:[#allocation5 + $0x244] ss:$8 sps:$4 sm:$0xff]  }
  0xae   : > { %2144 = vmatprep.mubr.bf16.mxu0 %v354_v42  ;;  %v3151_v42 = vld [vmem:[#allocation5 + $0x654] ss:$8 sps:$4 sm:$0xff]  }
  0xaf   : > { %1951 = vmatpush1.bf16.msra.mxu1 %v3026_v15  ;;  %v337_v15 = vld [vmem:[%s3646_s10 + $0x50] sm:$0xff] }
  0xb0   : > { %2115 = vmatpush1.bf16.msra.mxu0 %v3029_v16  ;;  %1952 = vmatprep.subr.bf16.mxu1 %v3034_v17  ;;  %v3121_v16 = vld [vmem:[#allocation5 + $0x604] ss:$8 sps:$4 sm:$0xff]   ;;  %v3116_v17 = vld [vmem:[#allocation5 + $0x200] ss:$8 sps:$4 sm:$0xff]  }
  0xb1   : > { %2116 = vmatprep.subr.bf16.mxu0 %v3037_v18  ;;  %v3119_v18 = vld [vmem:[#allocation5 + $0x600] ss:$8 sps:$4 sm:$0xff]  }
  0xb3   : > { %1953 = vmatpush1.bf16.msra.mxu1 %v3032_v19  ;;  %v345_v19 = vpack.c.bf16 %v329_v14, %v329_v14  ;;  %v3205_v14 = vld [vmem:[#allocation5 + $0x6e4] ss:$8 sps:$4 sm:$0xff]  }
  0xb4   : > { %2117 = vmatpush1.bf16.msra.mxu0 %v3035_v20  ;;  %1954 = vmatprep.subr.bf16.mxu1 %v3040_v21  ;;  %v353_v20 = vpack.c.bf16 %v337_v15, %v337_v15  ;;  %v3124_v21 = vld [vmem:[#allocation5 + $0x214] ss:$8 sps:$4 sm:$0xff]   ;;  %v3200_v15 = vld [vmem:[#allocation5 + $0x2e0] ss:$8 sps:$4 sm:$0xff]  }
  0xb5   : > { %2118 = vmatprep.subr.bf16.mxu0 %v3043_v22  ;;  %v3127_v22 = vld [vmem:[#allocation5 + $0x614] ss:$8 sps:$4 sm:$0xff]  }
  0xb7   : > { %1955 = vmatpush1.bf16.msra.mxu1 %v3038_v23  ;;  %v332_v23 = vld [vmem:[%s3646_s10 + $0x28] sm:$0xff] }
  0xb8   : > { %2119 = vmatpush1.bf16.msra.mxu0 %v3041_v24  ;;  %1956 = vmatprep.subr.bf16.mxu1 %v3046_v25  ;;  %v3122_v24 = vld [vmem:[#allocation5 + $0x210] ss:$8 sps:$4 sm:$0xff]   ;;  %v348_v25 = vpack.c.bf16 %v332_v23, %v332_v23  ;;  %v3217_v23 = vld [vmem:[#allocation5 + $0x704] ss:$8 sps:$4 sm:$0xff]  }
  0xb9   : > { %2120 = vmatprep.subr.bf16.mxu0 %v3049_v26  ;;  %v3125_v26 = vld [vmem:[#allocation5 + $0x610] ss:$8 sps:$4 sm:$0xff]  }
  0xbb   : > { %1957 = vmatpush1.bf16.msra.mxu1 %v3044_v27  ;;  %v340_v27 = vld [vmem:[%s3646_s10 + $0x68] sm:$0xff] }
  0xbc   : > { %2121 = vmatpush1.bf16.msra.mxu0 %v3047_v28  ;;  %1958 = vmatprep.subr.bf16.mxu1 %v3052_v29  ;;  %v3130_v28 = vld [vmem:[#allocation5 + $0x224] ss:$8 sps:$4 sm:$0xff]  }
  0xbd   : > { %2122 = vmatprep.subr.bf16.mxu0 %v3055_v30  ;;  %v3133_v29 = vld [vmem:[#allocation5 + $0x624] ss:$8 sps:$4 sm:$0xff]   ;;  %v356_v30 = vpack.c.bf16 %v340_v27, %v340_v27  ;;  %v334_v27 = vld [vmem:[%s3646_s10 + $0x38] sm:$0xff] }
  0xbf   : > { %1959 = vmatpush1.bf16.msra.mxu1 %v3050_v31  ;;  %v3128_v31 = vld [vmem:[#allocation5 + $0x220] ss:$8 sps:$4 sm:$0xff]  }
  0xc0   : > { %2123 = vmatpush1.bf16.msra.mxu0 %v3053_v32  ;;  %1960 = vmatprep.subr.bf16.mxu1 %v3058_v33  ;;  %v3131_v32 = vld [vmem:[#allocation5 + $0x620] ss:$8 sps:$4 sm:$0xff]   ;;  %v3136_v33 = vld [vmem:[#allocation5 + $0x234] ss:$8 sps:$4 sm:$0xff]  }
  0xc1   : > { %2124 = vmatprep.subr.bf16.mxu0 %v3061_v34  ;;  %v3139_v34 = vld [vmem:[#allocation5 + $0x634] ss:$8 sps:$4 sm:$0xff]  }
  0xc3   : > { %1961 = vmatpush1.bf16.msra.mxu1 %v3056_v36  ;;  %v3137_v36 = vld [vmem:[#allocation5 + $0x630] ss:$8 sps:$4 sm:$0xff]  }
  0xc4   : > { %2125 = vmatpush1.bf16.msra.mxu0 %v3059_v38  ;;  %1962 = vmatprep.subr.bf16.mxu1 %v3064_v40  ;;  %v3145_v38 = vld [vmem:[#allocation5 + $0x644] ss:$8 sps:$4 sm:$0xff]   ;;  %v3143_v40 = vld [vmem:[#allocation5 + $0x640] ss:$8 sps:$4 sm:$0xff]  }
  0xc5   : > { %2126 = vmatprep.subr.bf16.mxu0 %v3067_v41  ;;  %v3148_v41 = vld [vmem:[#allocation5 + $0x254] ss:$8 sps:$4 sm:$0xff]  }
  0xc7   : > { %1963 = vmatpush1.bf16.msra.mxu1 %v3062_v43  ;;  %v3146_v43 = vld [vmem:[#allocation5 + $0x250] ss:$8 sps:$4 sm:$0xff]  }
  0xc8   : > { %2127 = vmatpush1.bf16.msra.mxu0 %v3065_v44  ;;  %1964 = vmatprep.subr.bf16.mxu1 %v3070_v45  ;;  %v3149_v44 = vld [vmem:[#allocation5 + $0x650] ss:$8 sps:$4 sm:$0xff]   ;;  %v3154_v45 = vld [vmem:[#allocation5 + $0x264] ss:$8 sps:$4 sm:$0xff]  }
  0xc9   : > { %2128 = vmatprep.subr.bf16.mxu0 %v3073_v46  ;;  %v3157_v46 = vld [vmem:[#allocation5 + $0x664] ss:$8 sps:$4 sm:$0xff]  }
  0xcb   : > { %1965 = vmatpush1.bf16.msra.mxu1 %v3068_v47  ;;  %v3152_v47 = vld [vmem:[#allocation5 + $0x260] ss:$8 sps:$4 sm:$0xff]  }
  0xcc   : > { %2129 = vmatpush1.bf16.msra.mxu0 %v3071_v48  ;;  %1966 = vmatprep.subr.bf16.mxu1 %v3076_v49  ;;  %v3155_v48 = vld [vmem:[#allocation5 + $0x660] ss:$8 sps:$4 sm:$0xff]   ;;  %v3160_v49 = vld [vmem:[#allocation5 + $0x274] ss:$8 sps:$4 sm:$0xff]  }
  0xcd   : > { %2130 = vmatprep.subr.bf16.mxu0 %v3079_v50  ;;  %v3163_v50 = vld [vmem:[#allocation5 + $0x674] ss:$8 sps:$4 sm:$0xff]  }
  0xcf   : > { %1967 = vmatpush1.bf16.msra.mxu1 %v3074_v51  ;;  %v3158_v51 = vld [vmem:[#allocation5 + $0x270] ss:$8 sps:$4 sm:$0xff]  }
  0xd0   : > { %2131 = vmatpush1.bf16.msra.mxu0 %v3077_v52  ;;  %1968 = vmatprep.subr.bf16.mxu1 %v3082_v53  ;;  %v3161_v52 = vld [vmem:[#allocation5 + $0x670] ss:$8 sps:$4 sm:$0xff]   ;;  %v3166_v53 = vld [vmem:[#allocation5 + $0x284] ss:$8 sps:$4 sm:$0xff]  }
  0xd1   : > { %2132 = vmatprep.subr.bf16.mxu0 %v3085_v54  ;;  %v3169_v54 = vld [vmem:[#allocation5 + $0x684] ss:$8 sps:$4 sm:$0xff]  }
  0xd3   : > { %1969 = vmatpush1.bf16.msra.mxu1 %v3080_v55  ;;  %v3164_v55 = vld [vmem:[#allocation5 + $0x280] ss:$8 sps:$4 sm:$0xff]  }
  0xd4   : > { %2133 = vmatpush1.bf16.msra.mxu0 %v3083_v56  ;;  %1970 = vmatprep.subr.bf16.mxu1 %v3088_v57  ;;  %v3167_v56 = vld [vmem:[#allocation5 + $0x680] ss:$8 sps:$4 sm:$0xff]   ;;  %v3172_v57 = vld [vmem:[#allocation5 + $0x294] ss:$8 sps:$4 sm:$0xff]  }
  0xd5   : > { %2134 = vmatprep.subr.bf16.mxu0 %v3091_v58  ;;  %v3175_v58 = vld [vmem:[#allocation5 + $0x694] ss:$8 sps:$4 sm:$0xff]  }
  0xd7   : > { %1971 = vmatpush1.bf16.msra.mxu1 %v3086_v59  ;;  %v3170_v59 = vld [vmem:[#allocation5 + $0x290] ss:$8 sps:$4 sm:$0xff]  }
  0xd8   : > { %2135 = vmatpush1.bf16.msra.mxu0 %v3089_v60  ;;  %1972 = vmatprep.subr.bf16.mxu1 %v3094_v61  ;;  %v3173_v60 = vld [vmem:[#allocation5 + $0x690] ss:$8 sps:$4 sm:$0xff]   ;;  %v3178_v61 = vld [vmem:[#allocation5 + $0x2a4] ss:$8 sps:$4 sm:$0xff]  }
  0xd9   : > { %2136 = vmatprep.subr.bf16.mxu0 %v3097_v62  ;;  %v3181_v62 = vld [vmem:[#allocation5 + $0x6a4] ss:$8 sps:$4 sm:$0xff]  }
  0xdb   : > { %1973 = vmatpush1.bf16.msra.mxu1 %v3092_v63  ;;  %v3176_v63 = vld [vmem:[#allocation5 + $0x2a0] ss:$8 sps:$4 sm:$0xff]  }
  0xdc   : > { %2137 = vmatpush1.bf16.msra.mxu0 %v3095_v0  ;;  %1974 = vmatprep.subr.bf16.mxu1 %v3100_v1  ;;  %v3179_v0 = vld [vmem:[#allocation5 + $0x6a0] ss:$8 sps:$4 sm:$0xff]   ;;  %v3184_v1 = vld [vmem:[#allocation5 + $0x2b4] ss:$8 sps:$4 sm:$0xff]  }
  0xdd   : > { %2138 = vmatprep.subr.bf16.mxu0 %v3103_v2  ;;  %v3187_v2 = vld [vmem:[#allocation5 + $0x6b4] ss:$8 sps:$4 sm:$0xff]  }
  0xdf   : > { %1975 = vmatpush1.bf16.msra.mxu1 %v3098_v3  ;;  %v3182_v3 = vld [vmem:[#allocation5 + $0x2b0] ss:$8 sps:$4 sm:$0xff]  }
  0xe0   : > { %2139 = vmatpush1.bf16.msra.mxu0 %v3101_v4  ;;  %1976 = vmatprep.subr.bf16.mxu1 %v3106_v5  ;;  %v3185_v4 = vld [vmem:[#allocation5 + $0x6b0] ss:$8 sps:$4 sm:$0xff]   ;;  %v3190_v5 = vld [vmem:[#allocation5 + $0x2c4] ss:$8 sps:$4 sm:$0xff]  }
  0xe1   : > { %2140 = vmatprep.subr.bf16.mxu0 %v3109_v6  ;;  %v3193_v6 = vld [vmem:[#allocation5 + $0x6c4] ss:$8 sps:$4 sm:$0xff]  }
  0xe3   : > { %1977 = vmatpush1.bf16.msra.mxu1 %v3104_v7  ;;  %v3188_v7 = vld [vmem:[#allocation5 + $0x2c0] ss:$8 sps:$4 sm:$0xff]  }
  0xe4   : > { %2141 = vmatpush1.bf16.msra.mxu0 %v3107_v8  ;;  %1978 = vmatprep.subr.bf16.mxu1 %v3112_v9  ;;  %v3191_v8 = vld [vmem:[#allocation5 + $0x6c0] ss:$8 sps:$4 sm:$0xff]   ;;  %v3196_v9 = vld [vmem:[#allocation5 + $0x2d4] ss:$8 sps:$4 sm:$0xff]  }
  0xe5   : > { %2142 = vmatprep.subr.bf16.mxu0 %v3115_v10  ;;  %v3199_v10 = vld [vmem:[#allocation5 + $0x6d4] ss:$8 sps:$4 sm:$0xff]  }
  0xe7   : > { %1979 = vmatpush1.bf16.msra.mxu1 %v3110_v11  ;;  %v3194_v11 = vld [vmem:[#allocation5 + $0x2d0] ss:$8 sps:$4 sm:$0xff]  }
  0xe8   : > { %2143 = vmatpush1.bf16.msra.mxu0 %v3113_v12  ;;  %1989 = vmatprep.subr.bf16.mxu1 %v3118_v13  ;;  %v3197_v12 = vld [vmem:[#allocation5 + $0x6d0] ss:$8 sps:$4 sm:$0xff]   ;;  %v3202_v13 = vld [vmem:[#allocation5 + $0x2e4] ss:$8 sps:$4 sm:$0xff]  }
  0xe9   : > { %2153 = vmatprep.subr.bf16.mxu0 %v3121_v16  ;;  %v3203_v16 = vld [vmem:[#allocation5 + $0x6e0] ss:$8 sps:$4 sm:$0xff]  }
  0xea   : > { %1981 = vmatmul.mubr.bf16.vlgmr.msra.gmra.mrb[0].mxu1 %v345_v19  ;;  %v3206_v19 = vld [vmem:[#allocation5 + $0x2f0] ss:$8 sps:$4 sm:$0xff]  }
  0xeb   : > { %2145 = vmatmul.mubr.bf16.vlgmr.msra.gmra.mrb[0].mxu0 %v353_v20  ;;  %1990 = vmatpush1.bf16.msra.mxu1 %v3116_v17  ;;  %v3208_v17 = vld [vmem:[#allocation5 + $0x2f4] ss:$8 sps:$4 sm:$0xff]   ;;  %v3209_v20 = vld [vmem:[#allocation5 + $0x6f0] ss:$8 sps:$4 sm:$0xff]  }
  0xec   : > { %2154 = vmatpush1.bf16.msra.mxu0 %v3119_v18  ;;  %1991 = vmatprep.subr.bf16.mxu1 %v3124_v21  ;;  %v3211_v18 = vld [vmem:[#allocation5 + $0x6f4] ss:$8 sps:$4 sm:$0xff]   ;;  %v331_v21 = vld [vmem:[%s3646_s10 + $0x20] sm:$0xff] }
  0xed   : > { %2155 = vmatprep.subr.bf16.mxu0 %v3127_v22  ;;  %2021 = vmatprep.mubr.bf16.mxu1 %v348_v25  ;;  %v3214_v22 = vld [vmem:[#allocation5 + $0x304] ss:$8 sps:$4 sm:$0xff]   ;;  %v347_v25 = vpack.c.bf16 %v331_v21, %v331_v21 }
  0xee   : > { %2185 = vmatprep.mubr.bf16.mxu0 %v356_v30  ;;  %v3215_v30 = vld [vmem:[#allocation5 + $0x700] ss:$8 sps:$4 sm:$0xff]   ;;  %v3298_v21 = vld [vmem:[#allocation5 + $0x3e4] ss:$8 sps:$4 sm:$0xff]  }
  0xef   : > { %1992 = vmatpush1.bf16.msra.mxu1 %v3122_v24  ;;  %v339_v24 = vld [vmem:[%s3646_s10 + $0x60] sm:$0xff] }
  0xf0   : > { %2156 = vmatpush1.bf16.msra.mxu0 %v3125_v26  ;;  %1993 = vmatprep.subr.bf16.mxu1 %v3130_v28  ;;  %v355_v26 = vpack.c.bf16 %v339_v24, %v339_v24  ;;  %v342_v28 = vld [vmem:[%s3646_s10 + $0x78] sm:$0xff]  ;;  %v3299_v24 = vld [vmem:[#allocation5 + $0x7e0] ss:$8 sps:$4 sm:$0xff]  }
  0xf1   : > { %2157 = vmatprep.subr.bf16.mxu0 %v3133_v29  ;;  %v3212_v29 = vld [vmem:[#allocation5 + $0x300] ss:$8 sps:$4 sm:$0xff]  }
  0xf3   : > { %1994 = vmatpush1.bf16.msra.mxu1 %v3128_v31  ;;  %v3220_v31 = vld [vmem:[#allocation5 + $0x314] ss:$8 sps:$4 sm:$0xff]  }
  0xf4   : > { %2158 = vmatpush1.bf16.msra.mxu0 %v3131_v32  ;;  %1995 = vmatprep.subr.bf16.mxu1 %v3136_v33  ;;  %v3223_v32 = vld [vmem:[#allocation5 + $0x714] ss:$8 sps:$4 sm:$0xff]   ;;  %v350_v33 = vpack.c.bf16 %v334_v27, %v334_v27  ;;  %v3302_v27 = vld [vmem:[#allocation5 + $0x3f0] ss:$8 sps:$4 sm:$0xff]  }
  0xf5   : > { %2159 = vmatprep.subr.bf16.mxu0 %v3139_v34  ;;  %v358_v34 = vpack.c.bf16 %v342_v28, %v342_v28  ;;  %v3305_v28 = vld [vmem:[#allocation5 + $0x7f0] ss:$8 sps:$4 sm:$0xff]  }
  0xf7   : > { %1996 = vmatpush1.bf16.msra.mxu1 %v3134_v35  ;;  %v3218_v35 = vld [vmem:[#allocation5 + $0x310] ss:$8 sps:$4 sm:$0xff]  }
  0xf8   : > { %2160 = vmatpush1.bf16.msra.mxu0 %v3137_v36  ;;  %1997 = vmatprep.subr.bf16.mxu1 %v3142_v37  ;;  %v3221_v36 = vld [vmem:[#allocation5 + $0x710] ss:$8 sps:$4 sm:$0xff]   ;;  %v3226_v37 = vld [vmem:[#allocation5 + $0x324] ss:$8 sps:$4 sm:$0xff]  }
  0xf9   : > { %2161 = vmatprep.subr.bf16.mxu0 %v3145_v38  ;;  %v3229_v38 = vld [vmem:[#allocation5 + $0x724] ss:$8 sps:$4 sm:$0xff]  }
  0xfb   : > { %1998 = vmatpush1.bf16.msra.mxu1 %v3140_v39  ;;  %v3224_v39 = vld [vmem:[#allocation5 + $0x320] ss:$8 sps:$4 sm:$0xff]  }
  0xfc   : > { %2162 = vmatpush1.bf16.msra.mxu0 %v3143_v40  ;;  %1999 = vmatprep.subr.bf16.mxu1 %v3148_v41  ;;  %v3227_v40 = vld [vmem:[#allocation5 + $0x720] ss:$8 sps:$4 sm:$0xff]   ;;  %v3232_v41 = vld [vmem:[#allocation5 + $0x334] ss:$8 sps:$4 sm:$0xff]  }
  0xfd   : > { %2163 = vmatprep.subr.bf16.mxu0 %v3151_v42  ;;  %v3235_v42 = vld [vmem:[#allocation5 + $0x734] ss:$8 sps:$4 sm:$0xff]  }
  0xff   : > { %2000 = vmatpush1.bf16.msra.mxu1 %v3146_v43  ;;  %v3230_v43 = vld [vmem:[#allocation5 + $0x330] ss:$8 sps:$4 sm:$0xff]  }
 0x100   : > { %2164 = vmatpush1.bf16.msra.mxu0 %v3149_v44  ;;  %2001 = vmatprep.subr.bf16.mxu1 %v3154_v45  ;;  %v3233_v44 = vld [vmem:[#allocation5 + $0x730] ss:$8 sps:$4 sm:$0xff]   ;;  %v3238_v45 = vld [vmem:[#allocation5 + $0x344] ss:$8 sps:$4 sm:$0xff]  }
 0x101   : > { %2165 = vmatprep.subr.bf16.mxu0 %v3157_v46  ;;  %v3241_v46 = vld [vmem:[#allocation5 + $0x744] ss:$8 sps:$4 sm:$0xff]  }
 0x103   : > { %2002 = vmatpush1.bf16.msra.mxu1 %v3152_v47  ;;  %v3236_v47 = vld [vmem:[#allocation5 + $0x340] ss:$8 sps:$4 sm:$0xff]  }
 0x104   : > { %2166 = vmatpush1.bf16.msra.mxu0 %v3155_v48  ;;  %2003 = vmatprep.subr.bf16.mxu1 %v3160_v49  ;;  %v3239_v48 = vld [vmem:[#allocation5 + $0x740] ss:$8 sps:$4 sm:$0xff]   ;;  %v3244_v49 = vld [vmem:[#allocation5 + $0x354] ss:$8 sps:$4 sm:$0xff]  }
 0x105   : > { %2167 = vmatprep.subr.bf16.mxu0 %v3163_v50  ;;  %v3247_v50 = vld [vmem:[#allocation5 + $0x754] ss:$8 sps:$4 sm:$0xff]  }
 0x107   : > { %2004 = vmatpush1.bf16.msra.mxu1 %v3158_v51  ;;  %v3242_v51 = vld [vmem:[#allocation5 + $0x350] ss:$8 sps:$4 sm:$0xff]  }
 0x108   : > { %2168 = vmatpush1.bf16.msra.mxu0 %v3161_v52  ;;  %2005 = vmatprep.subr.bf16.mxu1 %v3166_v53  ;;  %v3245_v52 = vld [vmem:[#allocation5 + $0x750] ss:$8 sps:$4 sm:$0xff]   ;;  %v3250_v53 = vld [vmem:[#allocation5 + $0x364] ss:$8 sps:$4 sm:$0xff]  }
 0x109   : > { %2169 = vmatprep.subr.bf16.mxu0 %v3169_v54  ;;  %v3253_v54 = vld [vmem:[#allocation5 + $0x764] ss:$8 sps:$4 sm:$0xff]  }
 0x10b   : > { %2006 = vmatpush1.bf16.msra.mxu1 %v3164_v55  ;;  %v3248_v55 = vld [vmem:[#allocation5 + $0x360] ss:$8 sps:$4 sm:$0xff]  }
 0x10c   : > { %2170 = vmatpush1.bf16.msra.mxu0 %v3167_v56  ;;  %2007 = vmatprep.subr.bf16.mxu1 %v3172_v57  ;;  %v3251_v56 = vld [vmem:[#allocation5 + $0x760] ss:$8 sps:$4 sm:$0xff]   ;;  %v3256_v57 = vld [vmem:[#allocation5 + $0x374] ss:$8 sps:$4 sm:$0xff]  }
 0x10d   : > { %2171 = vmatprep.subr.bf16.mxu0 %v3175_v58  ;;  %v3259_v58 = vld [vmem:[#allocation5 + $0x774] ss:$8 sps:$4 sm:$0xff]  }
 0x10f   : > { %2008 = vmatpush1.bf16.msra.mxu1 %v3170_v59  ;;  %v3254_v59 = vld [vmem:[#allocation5 + $0x370] ss:$8 sps:$4 sm:$0xff]  }
 0x110   : > { %2172 = vmatpush1.bf16.msra.mxu0 %v3173_v60  ;;  %2009 = vmatprep.subr.bf16.mxu1 %v3178_v61  ;;  %v3257_v60 = vld [vmem:[#allocation5 + $0x770] ss:$8 sps:$4 sm:$0xff]   ;;  %v3262_v61 = vld [vmem:[#allocation5 + $0x384] ss:$8 sps:$4 sm:$0xff]  }
 0x111   : > { %2173 = vmatprep.subr.bf16.mxu0 %v3181_v62  ;;  %v3265_v62 = vld [vmem:[#allocation5 + $0x784] ss:$8 sps:$4 sm:$0xff]  }
 0x113   : > { %2010 = vmatpush1.bf16.msra.mxu1 %v3176_v63  ;;  %v3260_v63 = vld [vmem:[#allocation5 + $0x380] ss:$8 sps:$4 sm:$0xff]  }
 0x114   : > { %2174 = vmatpush1.bf16.msra.mxu0 %v3179_v0  ;;  %2011 = vmatprep.subr.bf16.mxu1 %v3184_v1  ;;  %v3263_v0 = vld [vmem:[#allocation5 + $0x780] ss:$8 sps:$4 sm:$0xff]   ;;  %v3268_v1 = vld [vmem:[#allocation5 + $0x394] ss:$8 sps:$4 sm:$0xff]  }
 0x115   : > { %2175 = vmatprep.subr.bf16.mxu0 %v3187_v2  ;;  %v3271_v2 = vld [vmem:[#allocation5 + $0x794] ss:$8 sps:$4 sm:$0xff]  }
 0x117   : > { %2012 = vmatpush1.bf16.msra.mxu1 %v3182_v3  ;;  %v3266_v3 = vld [vmem:[#allocation5 + $0x390] ss:$8 sps:$4 sm:$0xff]  }
 0x118   : > { %2176 = vmatpush1.bf16.msra.mxu0 %v3185_v4  ;;  %2013 = vmatprep.subr.bf16.mxu1 %v3190_v5  ;;  %v3269_v4 = vld [vmem:[#allocation5 + $0x790] ss:$8 sps:$4 sm:$0xff]   ;;  %v3274_v5 = vld [vmem:[#allocation5 + $0x3a4] ss:$8 sps:$4 sm:$0xff]  }
 0x119   : > { %2177 = vmatprep.subr.bf16.mxu0 %v3193_v6  ;;  %v3277_v6 = vld [vmem:[#allocation5 + $0x7a4] ss:$8 sps:$4 sm:$0xff]  }
 0x11b   : > { %2014 = vmatpush1.bf16.msra.mxu1 %v3188_v7  ;;  %v3272_v7 = vld [vmem:[#allocation5 + $0x3a0] ss:$8 sps:$4 sm:$0xff]  }
 0x11c   : > { %2178 = vmatpush1.bf16.msra.mxu0 %v3191_v8  ;;  %2015 = vmatprep.subr.bf16.mxu1 %v3196_v9  ;;  %v3275_v8 = vld [vmem:[#allocation5 + $0x7a0] ss:$8 sps:$4 sm:$0xff]   ;;  %v3280_v9 = vld [vmem:[#allocation5 + $0x3b4] ss:$8 sps:$4 sm:$0xff]  }
 0x11d   : > { %2179 = vmatprep.subr.bf16.mxu0 %v3199_v10  ;;  %v3283_v10 = vld [vmem:[#allocation5 + $0x7b4] ss:$8 sps:$4 sm:$0xff]  }
 0x11f   : > { %2016 = vmatpush1.bf16.msra.mxu1 %v3194_v11  ;;  %v3278_v11 = vld [vmem:[#allocation5 + $0x3b0] ss:$8 sps:$4 sm:$0xff]  }
 0x120   : > { %2180 = vmatpush1.bf16.msra.mxu0 %v3197_v12  ;;  %2017 = vmatprep.subr.bf16.mxu1 %v3202_v13  ;;  %v3281_v12 = vld [vmem:[#allocation5 + $0x7b0] ss:$8 sps:$4 sm:$0xff]   ;;  %v3286_v13 = vld [vmem:[#allocation5 + $0x3c4] ss:$8 sps:$4 sm:$0xff]  }
 0x121   : > { %2181 = vmatprep.subr.bf16.mxu0 %v3205_v14  ;;  %v3289_v14 = vld [vmem:[#allocation5 + $0x7c4] ss:$8 sps:$4 sm:$0xff]  }
 0x123   : > { %2018 = vmatpush1.bf16.msra.mxu1 %v3200_v15  ;;  %v3284_v15 = vld [vmem:[#allocation5 + $0x3c0] ss:$8 sps:$4 sm:$0xff]  }
 0x124   : > { %2182 = vmatpush1.bf16.msra.mxu0 %v3203_v16  ;;  %2019 = vmatprep.subr.bf16.mxu1 %v3208_v17  ;;  %v3287_v16 = vld [vmem:[#allocation5 + $0x7c0] ss:$8 sps:$4 sm:$0xff]   ;;  %v3292_v17 = vld [vmem:[#allocation5 + $0x3d4] ss:$8 sps:$4 sm:$0xff]  }
 0x125   : > { %2183 = vmatprep.subr.bf16.mxu0 %v3211_v18  ;;  %v3295_v18 = vld [vmem:[#allocation5 + $0x7d4] ss:$8 sps:$4 sm:$0xff]  }
 0x127   : > { %2020 = vmatpush1.bf16.msra.mxu1 %v3206_v19  ;;  %v3290_v19 = vld [vmem:[#allocation5 + $0x3d0] ss:$8 sps:$4 sm:$0xff]  }
 0x128   : > { %2184 = vmatpush1.bf16.msra.mxu0 %v3209_v20  ;;  %2030 = vmatprep.subr.bf16.mxu1 %v3214_v22  ;;  %v3293_v20 = vld [vmem:[#allocation5 + $0x7d0] ss:$8 sps:$4 sm:$0xff]   ;;  %v3301_v22 = vld [vmem:[#allocation5 + $0x7e4] ss:$8 sps:$4 sm:$0xff]  }
 0x129   : > { %2194 = vmatprep.subr.bf16.mxu0 %v3217_v23  ;;  %v3296_v23 = vld [vmem:[#allocation5 + $0x3e0] ss:$8 sps:$4 sm:$0xff]  }
 0x12a   : > { %2022 = vmatmul.mubr.bf16.vlgmr.msra.gmra.mrb[0].mxu1 %v347_v25  ;;  %v3304_v25 = vld [vmem:[#allocation5 + $0x3f4] ss:$8 sps:$4 sm:$0xff]  }
 0x12b   : > { %2186 = vmatmul.mubr.bf16.vlgmr.msra.gmra.mrb[0].mxu0 %v355_v26  ;;  %2031 = vmatpush1.bf16.msra.mxu1 %v3212_v29  ;;  %v3307_v26 = vld [vmem:[#allocation5 + $0x7f4] ss:$8 sps:$4 sm:$0xff]  }
 0x12c   : > { %2195 = vmatpush1.bf16.msra.mxu0 %v3215_v30  ;;  %2032 = vmatprep.subr.bf16.mxu1 %v3220_v31  ;;  %v333_v29 = vld [vmem:[%s3646_s10 + $0x30] sm:$0xff]  ;;  %v3308_v31 = vld [vmem:[#allocation7 + $0x40] sm:$0xff]  }
 0x12d   : > { %2196 = vmatprep.subr.bf16.mxu0 %v3223_v32  ;;  %2062 = vmatprep.mubr.bf16.mxu1 %v350_v33  ;;  %v341_v30 = vld [vmem:[%s3646_s10 + $0x70] sm:$0xff]  ;;  %v349_v32 = vpack.c.bf16 %v333_v29, %v333_v29 }
 0x12e   : > { %2226 = vmatprep.mubr.bf16.mxu0 %v358_v34  ;;  %v357_v33 = vpack.c.bf16 %v341_v30, %v341_v30  ;;  %v3309_v34 = vld [vmem:[#allocation7] sm:$0xff]  }
 0x12f   : > { %2033 = vmatpush1.bf16.msra.mxu1 %v3218_v35  ;;  %v3310_v35 = vld [vmem:[#allocation7 + $0x48] sm:$0xff]  }
 0x130   : > { %2197 = vmatpush1.bf16.msra.mxu0 %v3221_v36  ;;  %2034 = vmatprep.subr.bf16.mxu1 %v3226_v37  ;;  %v3311_v36 = vld [vmem:[#allocation7 + $0x8] sm:$0xff]   ;;  %v3312_v37 = vld [vmem:[#allocation7 + $0x50] sm:$0xff]  }
 0x131   : > { %2198 = vmatprep.subr.bf16.mxu0 %v3229_v38  ;;  %v3313_v38 = vld [vmem:[#allocation7 + $0x10] sm:$0xff]  }
 0x133   : > { %2035 = vmatpush1.bf16.msra.mxu1 %v3224_v39  ;;  %v3314_v39 = vld [vmem:[#allocation7 + $0x58] sm:$0xff]  }
 0x134   : > { %2199 = vmatpush1.bf16.msra.mxu0 %v3227_v40  ;;  %2036 = vmatprep.subr.bf16.mxu1 %v3232_v41  ;;  %v3315_v40 = vld [vmem:[#allocation7 + $0x18] sm:$0xff]   ;;  %v3316_v41 = vld [vmem:[#allocation7 + $0x60] sm:$0xff]  }
 0x135   : > { %2200 = vmatprep.subr.bf16.mxu0 %v3235_v42  ;;  %v3317_v42 = vld [vmem:[#allocation7 + $0x20] sm:$0xff]  }
 0x137   : > { %2037 = vmatpush1.bf16.msra.mxu1 %v3230_v43  ;;  %v3318_v43 = vld [vmem:[#allocation7 + $0x68] sm:$0xff]  }
 0x138   : > { %2201 = vmatpush1.bf16.msra.mxu0 %v3233_v44  ;;  %2038 = vmatprep.subr.bf16.mxu1 %v3238_v45  ;;  %v3319_v44 = vld [vmem:[#allocation7 + $0x28] sm:$0xff]   ;;  %v3320_v45 = vld [vmem:[#allocation7 + $0x70] sm:$0xff]  }
 0x139   : > { %2202 = vmatprep.subr.bf16.mxu0 %v3241_v46  ;;  %v3321_v46 = vld [vmem:[#allocation7 + $0x30] sm:$0xff]  }
 0x13b   : > { %2039 = vmatpush1.bf16.msra.mxu1 %v3236_v47  ;;  %v3322_v47 = vld [vmem:[#allocation7 + $0x78] sm:$0xff]  }
 0x13c   : > { %2203 = vmatpush1.bf16.msra.mxu0 %v3239_v48  ;;  %2040 = vmatprep.subr.bf16.mxu1 %v3244_v49  ;;  %v3323_v48 = vld [vmem:[#allocation7 + $0x38] sm:$0xff]   ;;  %v617_v49 = vlaneseq }
 0x13d   : > { %2204 = vmatprep.subr.bf16.mxu0 %v3247_v50 }
 0x13e   : > { %v618_v50 = vshrl.u32 %v617_v49, 7 }
 0x13f   : > { %2041 = vmatpush1.bf16.msra.mxu1 %v3242_v51 }
 0x140   : > { %2205 = vmatpush1.bf16.msra.mxu0 %v3245_v52  ;;  %2042 = vmatprep.subr.bf16.mxu1 %v3250_v53  ;;  %v619_v51 = vsub.s32 0, %v618_v50  ;;  %v615_v52 = vld [vmem:[%s3701_s2] sm:$0x3]  ;;  %v623_v53 = vsub.s32 1, %v618_v50 }
 0x141   : > { %2206 = vmatprep.subr.bf16.mxu0 %v3253_v54 }
 0x142   : > { %v620_v54 = vrot.slane %v615_v52, %v619_v51 }
 0x143   : > { %2043 = vmatpush1.bf16.msra.mxu1 %v3248_v55  ;;  %v624_v55 = vrot.slane %v615_v52, %v623_v53 }
 0x144   : > { %2207 = vmatpush1.bf16.msra.mxu0 %v3251_v56  ;;  %2044 = vmatprep.subr.bf16.mxu1 %v3256_v57 }
 0x145   : > { %2208 = vmatprep.subr.bf16.mxu0 %v3259_v58 }
 0x147   : > { %2045 = vmatpush1.bf16.msra.mxu1 %v3254_v59 }
 0x148   : > { %2209 = vmatpush1.bf16.msra.mxu0 %v3257_v60  ;;  %2046 = vmatprep.subr.bf16.mxu1 %v3262_v61 }
 0x149   : > { %2210 = vmatprep.subr.bf16.mxu0 %v3265_v62 }
 0x14b   : > { %2047 = vmatpush1.bf16.msra.mxu1 %v3260_v63 }
 0x14c   : > { %2211 = vmatpush1.bf16.msra.mxu0 %v3263_v0  ;;  %2048 = vmatprep.subr.bf16.mxu1 %v3268_v1 }
 0x14d   : > { %2212 = vmatprep.subr.bf16.mxu0 %v3271_v2 }
 0x14f   : > { %2049 = vmatpush1.bf16.msra.mxu1 %v3266_v3 }
 0x150   : > { %2213 = vmatpush1.bf16.msra.mxu0 %v3269_v4  ;;  %2050 = vmatprep.subr.bf16.mxu1 %v3274_v5 }
 0x151   : > { %2214 = vmatprep.subr.bf16.mxu0 %v3277_v6 }
 0x153   : > { %2051 = vmatpush1.bf16.msra.mxu1 %v3272_v7 }
 0x154   : > { %2215 = vmatpush1.bf16.msra.mxu0 %v3275_v8  ;;  %2052 = vmatprep.subr.bf16.mxu1 %v3280_v9 }
 0x155   : > { %2216 = vmatprep.subr.bf16.mxu0 %v3283_v10  ;;  %v2788_v10 = vld [vmem:[%s3703_s4] ss:$0 sm:$0xff] }
 0x157   : > { %2053 = vmatpush1.bf16.msra.mxu1 %v3278_v11 }
 0x158   : > { %2217 = vmatpush1.bf16.msra.mxu0 %v3281_v12  ;;  %2054 = vmatprep.subr.bf16.mxu1 %v3286_v13 }
 0x159   : > { %2218 = vmatprep.subr.bf16.mxu0 %v3289_v14 }
 0x15b   : > { %2055 = vmatpush1.bf16.msra.mxu1 %v3284_v15  ;;  %v2805_v15 = vld [vmem:[%s3704_s5] ss:$0 sm:$0xff] }
 0x15c   : > { %2219 = vmatpush1.bf16.msra.mxu0 %v3287_v16  ;;  %2056 = vmatprep.subr.bf16.mxu1 %v3292_v17 }
 0x15d   : > { %2220 = vmatprep.subr.bf16.mxu0 %v3295_v18  ;;  %v2806_v18 = vld [vmem:[#allocation2] ss:$0 sm:$0xff] }
 0x15f   : > { %2057 = vmatpush1.bf16.msra.mxu1 %v3290_v19 }
 0x160   : > { %2221 = vmatpush1.bf16.msra.mxu0 %v3293_v20  ;;  %2058 = vmatprep.subr.bf16.mxu1 %v3298_v21 }
 0x161   : > { %2222 = vmatprep.subr.bf16.mxu0 %v3301_v22 }
 0x163   : > { %2059 = vmatpush1.bf16.msra.mxu1 %v3296_v23 }
 0x164   : > { %2223 = vmatpush1.bf16.msra.mxu0 %v3299_v24  ;;  %2060 = vmatprep.subr.bf16.mxu1 %v3304_v25 }
 0x165   : > { %2224 = vmatprep.subr.bf16.mxu0 %v3307_v26 }
 0x167   : > { %2061 = vmatpush1.bf16.msra.mxu1 %v3302_v27 }
 0x168   : > { %2225 = vmatpush1.bf16.msra.mxu0 %v3305_v28  ;;  %2810 = vmatprep.subr.bf16.mxu1 %v3308_v31 }
 0x16a   : > { %2063 = vmatmul.mubr.bf16.vlgmr.msra.gmra.mrb[0].mxu1 %v349_v32 }
 0x16b   : > { %2227 = vmatmul.mubr.bf16.vlgmr.msra.gmra.mrb[0].mxu0 %v357_v33  ;;  %2811 = vmatpush3.bf16.msra.mxu1 %v3309_v34 }
 0x16c   : > { %2812 = vmatprep.subr.bf16.mxu1 %v3310_v35 }
 0x16f   : > { %2813 = vmatpush3.bf16.msra.mxu1 %v3311_v36 }
 0x170   : > { %2814 = vmatprep.subr.bf16.mxu1 %v3312_v37 }
 0x173   : > { %2815 = vmatpush3.bf16.msra.mxu1 %v3313_v38 }
 0x174   : > { %2816 = vmatprep.subr.bf16.mxu1 %v3314_v39 }
 0x177   : > { %2817 = vmatpush3.bf16.msra.mxu1 %v3315_v40 }
 0x178   : > { %2818 = vmatprep.subr.bf16.mxu1 %v3316_v41 }
 0x17b   : > { %2819 = vmatpush3.bf16.msra.mxu1 %v3317_v42 }
 0x17c   : > { %2820 = vmatprep.subr.bf16.mxu1 %v3318_v43 }
 0x17f   : > { %2821 = vmatpush3.bf16.msra.mxu1 %v3319_v44 }
 0x180   : > { %2822 = vmatprep.subr.bf16.mxu1 %v3320_v45 }
 0x183   : > { %2823 = vmatpush3.bf16.msra.mxu1 %v3321_v46 }
 0x184   : > { %2824 = vmatprep.subr.bf16.mxu1 %v3322_v47 }
 0x187   : > { %2825 = vmatpush3.bf16.msra.mxu1 %v3323_v48 }
 0x23d   : > { %v2064_v56 = vpop.f32.mrb[0].mxu1 }
 0x23e   : > { %v2228_v57 = vpop.f32.mrb[0].mxu0  ;;  %v2832_v58 = vadd.f32 %v2064_v56, %v620_v54  ;;  %v2066_v59 = vpop.f32.mrb[1].mxu1 }
 0x23f   : > { %v2230_v60 = vpop.f32.mrb[1].mxu0  ;;  %v2834_v61 = vadd.f32 %v2066_v59, %v624_v55  ;;  %v2068_v62 = vpop.f32.mrb[2].mxu1 }
 0x240   : > { %v2232_v63 = vpop.f32.mrb[2].mxu0  ;;  %v2833_v0 = vadd.f32 %v2832_v58, %v2228_v57  ;;  %v2069_v1 = vpop.f32.mrb[3].mxu1 }
 0x241   : > { %v2233_v2 = vpop.f32.mrb[3].mxu0  ;;  %v2835_v3 = vadd.f32 %v2834_v61, %v2230_v60 }
 0x242   : > { %v2235_v4 = vmax.f32 %v2833_v0, 0.0 }
 0x243   : > { %v2236_v5 = vmax.f32 %v2835_v3, 0.0 }
 0x244   : > { %v2237_v7 = vpack.c.bf16 %v2235_v4, %v2235_v4 }
 0x245   : > { %v2238_v6 = vpack.c.bf16 %v2236_v5, %v2236_v5 }
 0x247   : > { %2406 = vmatprep.mubr.bf16.mxu1 %v2238_v6 }
 0x248   : > { %2407 = vmatmul.mubr.bf16.vlgmr.msra.gmra.mrb[4].mxu1 %v2237_v7 }
 0x31b   : > { %v2826_v8 = vpop.f32.mrb[4].mxu1 }
 0x31c   : > { %v2827_v9 = vpop.f32.mrb[5].mxu1 }
 0x31d   : > { %v2828_v11 = vadd.f32 %v2827_v9, %v2826_v8  ;;  %v2829_v12 = vpop.f32.mrb[6].mxu1 }
 0x31e   : > { %v2830_v13 = vpop.f32.mrb[7].mxu1 }
 0x31f   : > { %v2409_v14 = vadd.f32 %v2828_v11, %v2788_v10 }
 0x321   : > { %v2414_v16 = vmax.f32 %v2409_v14, 0.0 }
 0x323   : > { %v2422_v17 = vmul.f32 %v2805_v15, %v2414_v16 }
 0x325   : > { %2423 = vadd.xlane.f32.xlu0 %v2422_v17 }
 0x3b2   : > { %v2424_v19 = vpop.xlane.xlu0 %2423 }
 0x3b3   : > { %v2432_v20 = vadd.f32 %v2806_v18, %v2424_v19 }
 0x3b5   : > { %2434 = vst.msk [vmem:[%s325_s21] sm:$0xff] %vm2433_vm0, %v2432_v20 }
 0x3b6 PF: > { %p20_p9 = scmp.ge.s32.totalorder %s3593_s22, 4   ;;  %s3718_s26 = smov %s3440_s27 }
 0x3b7   : > { %s3719_s27 = smov %s3444_s28  ;;  %s3720_s28 = smov %s3602_s25 }
 0x3b8   : > { %s3721_s29 = smov %s3593_s22  ;;  %22 = sbr.rel (!%p20_p9) target bundleno = 7 (0x7), region = 96 }
 0x3bf   :  { %2454 = vsyncpa [#allocation4], 1 }
 0x3c0   :  { %2456 = vsyncpa [#allocation4 + $0x1], 1 }
 0x3c1   :  { %2457 = vsyncpa [#allocation6], 1 }

</bundles_post_ra>
